<compile_context>
chip_gen: v7x
topology: tpu7x:2x2x1
jax: 0.10.0
libtpu: 0.0.40
codegen_flags: <defaults>
</compile_context>

<pallas_src>
import functools

import jax
import jax.numpy as jnp
from jax.experimental import pallas as pl
from jax.experimental.pallas import tpu as pltpu


# ----------------------------------------------------------------------------
# Small helpers
# ----------------------------------------------------------------------------
def _round_up(n, m):
    return ((n + m - 1) // m) * m


def _round_down(n, m):
    return (n // m) * m


_VMEM_BUDGET = None


def _vmem_budget():
    """Per-core VMEM budget: 75% of the detected capacity, else a safe 48 MiB
    (fits v7x's 64 MiB and v5e/v6e's 128 MiB physical VMEM)."""
    global _VMEM_BUDGET
    if _VMEM_BUDGET is None:
        try:
            cap = int(pltpu.get_tpu_info().vmem_capacity_bytes)
            _VMEM_BUDGET = (cap * 3) // 4
        except Exception:
            _VMEM_BUDGET = 48 << 20
    return _VMEM_BUDGET


_BUFFERED1 = None


def _buffered1_supported():
    """Tiny dedicated probe: does pl.Buffered(1) (single-buffered resident
    block) lower and produce correct results on this jax/TPU combo?"""
    global _BUFFERED1
    if _BUFFERED1 is not None:
        return _BUFFERED1
    try:
        def _probe(w_ref, x_ref, o_ref):
            o_ref[...] = x_ref[...] + w_ref[...]

        x = jnp.arange(16 * 128, dtype=jnp.float32).reshape(16, 128)
        w = jnp.ones((8, 128), jnp.float32)
        out = pl.pallas_call(
            _probe,
            out_shape=jax.ShapeDtypeStruct((16, 128), jnp.float32),
            grid=(2,),
            in_specs=[pl.BlockSpec((8, 128), lambda i: (0, 0),
                                   pipeline_mode=pl.Buffered(1)),
                      pl.BlockSpec((8, 128), lambda i: (i, 0))],
            out_specs=pl.BlockSpec((8, 128), lambda i: (i, 0)),
        )(w, x)
        jax.block_until_ready(out)
        _BUFFERED1 = bool(jnp.allclose(out, x + 1.0))
    except Exception:
        _BUFFERED1 = False
    return _BUFFERED1


def _resident_spec(shape, single_buffer):
    """BlockSpec for a block identical on every grid step (weights / biases).
    Single-buffer it when supported to halve its VMEM footprint."""
    index_map = lambda *_: (0,) * len(shape)
    if single_buffer:
        return pl.BlockSpec(shape, index_map, pipeline_mode=pl.Buffered(1))
    return pl.BlockSpec(shape, index_map)


# ----------------------------------------------------------------------------
# Kernels
# ----------------------------------------------------------------------------
def _dcn_cross_kernel(*refs, low_rank, use_bias, diag_scale, x_is_x0):
    """One cross layer, full feature width per grid step."""
    it = iter(refs)
    x0_ref = next(it)
    x_ref = x0_ref if x_is_x0 else next(it)
    if low_rank:
        u_ref = next(it)
        bu_ref = next(it) if use_bias else None
        v_ref = next(it)
        bv_ref = next(it) if use_bias else None
    else:
        w_ref = next(it)
        b_ref = next(it) if use_bias else None
    o_ref = next(it)

    x_in = x_ref[...]                       # native dtype straight to the MXU
    if low_rank:
        h = jnp.dot(x_in, u_ref[...], preferred_element_type=jnp.float32)
        if use_bias:
            h = h + bu_ref[...]
        prod = jnp.dot(h.astype(v_ref.dtype), v_ref[...],
                       preferred_element_type=jnp.float32)
        if use_bias:
            prod = prod + bv_ref[...]
    else:
        prod = jnp.dot(x_in, w_ref[...], preferred_element_type=jnp.float32)
        if use_bias:
            prod = prod + b_ref[...]

    x_f32 = x_in.astype(jnp.float32)
    if diag_scale:                          # full-rank folds diag into W'
        prod = prod + jnp.float32(diag_scale) * x_f32
    x0_f32 = x_f32 if x_is_x0 else x0_ref[...].astype(jnp.float32)
    o_ref[...] = (x0_f32 * prod + x_f32).astype(o_ref.dtype)


def _dcn_cross_ntiled_kernel(*refs, use_bias, diag_scale, x_is_x0, tn):
    """Full-rank cross layer with the weight tiled along its output-feature
    axis (grid = (batch_tiles, D // tn)); avoids the big resident (D,D) block."""
    it = iter(refs)
    x0_ref = next(it)
    x_ref = x0_ref if x_is_x0 else next(it)
    w_ref = next(it)                        # (D, tn) block
    b_ref = next(it) if use_bias else None  # (1, tn) block
    o_ref = next(it)                        # (tb, tn) block

    prod = jnp.dot(x_ref[...], w_ref[...], preferred_element_type=jnp.float32)
    if use_bias:
        prod = prod + b_ref[...]

    col = pl.multiple_of(pl.program_id(1) * tn, tn)
    x_sl = x_ref[:, pl.ds(col, tn)].astype(jnp.float32)
    x0_sl = x_sl if x_is_x0 else x0_ref[:, pl.ds(col, tn)].astype(jnp.float32)
    if diag_scale:
        prod = prod + jnp.float32(diag_scale) * x_sl
    o_ref[...] = (x0_sl * prod + x_sl).astype(o_ref.dtype)


def _dcn_stack_kernel(*refs, low_rank, use_bias, diag_scale, num_layers,
                      x_is_x0):
    """Fused stack of cross layers over the same batch tile: all weights
    resident, activations read/written from HBM exactly once."""
    it = iter(refs)
    x0_ref = next(it)
    x_ref = x0_ref if x_is_x0 else next(it)
    per = (2 if low_rank else 1) * (2 if use_bias else 1)
    layer_refs = [tuple(next(it) for _ in range(per)) for _ in range(num_layers)]
    o_ref = next(it)

    x0_f32 = x0_ref[...].astype(jnp.float32)
    x_f32 = x0_f32 if x_is_x0 else x_ref[...].astype(jnp.float32)

    for lr in layer_refs:                   # static unroll over layers
        if low_rank:
            if use_bias:
                u_ref, bu_ref, v_ref, bv_ref = lr
            else:
                u_ref, v_ref = lr
                bu_ref = bv_ref = None
            h = jnp.dot(x_f32.astype(u_ref.dtype), u_ref[...],
                        preferred_element_type=jnp.float32)
            if use_bias:
                h = h + bu_ref[...]
            prod = jnp.dot(h.astype(v_ref.dtype), v_ref[...],
                           preferred_element_type=jnp.float32)
            if use_bias:
                prod = prod + bv_ref[...]
        else:
            if use_bias:
                w_ref, b_ref = lr
            else:
                (w_ref,) = lr
                b_ref = None
            prod = jnp.dot(x_f32.astype(w_ref.dtype), w_ref[...],
                           preferred_element_type=jnp.float32)
            if use_bias:
                prod = prod + b_ref[...]
        if diag_scale:
            prod = prod + jnp.float32(diag_scale) * x_f32
        x_f32 = x0_f32 * prod + x_f32

    o_ref[...] = x_f32.astype(o_ref.dtype)


# ----------------------------------------------------------------------------
# One-time parameter preparation (hoisted out of the forward path)
# ----------------------------------------------------------------------------
def prepare_dcn_cross_params(*, w=None, b=None, u=None, bu=None, v=None,
                             bv=None, diag_scale=0.0, param_dtype=None):
    """Transpose torch-layout (out, in) weights to (in, out), fold diag_scale
    into the full-rank weight diagonal, keep biases as f32 row vectors, and
    optionally cast weights (e.g. bf16 — recommended on v5e, halves weight
    HBM/VMEM traffic on all chips).

    Full-rank:  w (D, D), b (D,) or None.
    Low-rank :  u (P, D), bu (P,) or None, v (D, P), bv (D,) or None.
    """
    if diag_scale < 0.0:
        raise ValueError(f"`diag_scale` should be non-negative. Got {diag_scale}")

    if w is not None:
        D = w.shape[1]
        wt = jnp.transpose(w).astype(jnp.float32)              # (in, out)
        if diag_scale:
            wt = wt + jnp.float32(diag_scale) * jnp.eye(D, dtype=jnp.float32)
        wt = wt.astype(param_dtype if param_dtype is not None else w.dtype)
        params = {"kind": "full", "in_dim": int(D), "use_bias": b is not None,
                  "diag_scale": 0.0, "w": wt}                   # diag folded
        if b is not None:
            params["b"] = b.astype(jnp.float32).reshape(1, D)
        return params

    assert u is not None and v is not None, "low-rank needs both u and v"
    P, D = u.shape
    ut = jnp.transpose(u)                                       # (D, P)
    vt = jnp.transpose(v)                                       # (P, D)
    if param_dtype is not None:
        ut = ut.astype(param_dtype)
        vt = vt.astype(param_dtype)
    params = {"kind": "low", "in_dim": int(D), "proj_dim": int(P),
              "use_bias": bu is not None, "diag_scale": float(diag_scale),
              "u": ut, "v": vt}
    if bu is not None:
        assert bv is not None, "low-rank bias needs both bu and bv"
        params["bu"] = bu.astype(jnp.float32).reshape(1, P)
        params["bv"] = bv.astype(jnp.float32).reshape(1, D)
    return params


# ----------------------------------------------------------------------------
# Tile planning
# ----------------------------------------------------------------------------
def _plan_tiles(B, D, act_itemsize, fixed_bytes, streamed_bytes, x_is_x0,
                batch_tile, budget):
    """Pick the batch tile (bytes-based, sublane aligned) and vmem limit."""
    sub = max(8, 32 // act_itemsize)          # 8 f32 / 16 bf16 / 32 int8 rows
    row_bytes = D * act_itemsize
    n_streams = (1 if x_is_x0 else 2) + 1     # activation inputs + output
    # double-buffered activation streams + f32 epilogue temporaries (~4 tiles)
    per_row = 2 * n_streams * row_bytes + 4 * D * 4

    if batch_tile is not None:
        tb = int(batch_tile)
        if tb <= 0 or tb % 8 != 0:
            raise ValueError("batch_tile must be a positive multiple of 8")
    else:
        avail = max(budget - fixed_bytes - streamed_bytes, per_row * sub)
        cap_rows = avail // per_row
        target_rows = max(512, (3 << 20) // row_bytes)   # ~3 MiB activation tiles
        tb = min(cap_rows, target_rows)
        # Megacore / pipelining: prefer >= 8 grid steps if tiles stay >=~1.5 MiB.
        rows_8 = _round_up(-(-B // 8), sub)
        min_rows = _round_up(max(sub, (3 << 20) // (2 * row_bytes)), sub)
        if rows_8 >= min_rows:
            tb = min(tb, rows_8)
        tb = max(sub, _round_down(tb, sub))
        tb = min(tb, _round_up(B, 8))         # never bigger than needed

    nb = -(-B // tb)                          # cdiv; last block masked if partial
    est = (fixed_bytes + streamed_bytes + 2 * n_streams * tb * row_bytes
           + 4 * tb * D * 4 + (4 << 20))      # + headroom
    vmem_limit = int(min(budget, max(est, 32 << 20)))
    return int(tb), int(nb), vmem_limit


# ----------------------------------------------------------------------------
# Forward wrappers
# ----------------------------------------------------------------------------
def dcn_cross(x0, x=None, *, params, batch_tile=None, feature_tile=None):
    """Single DCNCross forward: out = x0 * (W(x) + bias + diag_scale*x) + x."""
    global _BUFFERED1

    low_rank = params["kind"] == "low"
    D = params["in_dim"]
    use_bias = params["use_bias"]
    diag_scale = float(params.get("diag_scale", 0.0))

    if x0.ndim != 2 or x0.shape[-1] != D:
        raise ValueError(f"x0 must be (batch, {D}), got {x0.shape}")
    x_is_x0 = (x is None) or (x is x0)
    if (x is not None) and (x.shape != x0.shape):
        raise ValueError("`x0` and `x` shape mismatch")

    B = x0.shape[0]
    out_dtype = x0.dtype
    act_itemsize = jnp.dtype(out_dtype).itemsize
    budget = _vmem_budget()
    single_buffer = _buffered1_supported()
    wbuf = 1 if single_buffer else 2

    # --- resident vs streamed weight accounting / N-tiling decision ---------
    n_tiled, tn = False, None
    if low_rank:
        P = params["proj_dim"]
        w_bytes = (params["u"].size * params["u"].dtype.itemsize
                   + params["v"].size * params["v"].dtype.itemsize)
        if use_bias:
            w_bytes += (params["bu"].size + params["bv"].size) * 4
        fixed_bytes, streamed_bytes = wbuf * w_bytes, 0
    else:
        w_bytes = params["w"].size * params["w"].dtype.itemsize
        if use_bias:
            w_bytes += params["b"].size * 4
        if feature_tile is not None:
            tn = int(feature_tile)
            if D % tn != 0 or tn % 128 != 0:
                raise ValueError("feature_tile must divide in_dim and be a "
                                 "multiple of 128")
            n_tiled = tn < D
        elif D % 128 == 0 and wbuf * w_bytes > budget // 3:
            for cand in (512, 256, 128):       # largest aligned divisor of D
                if D % cand == 0:
                    tn = cand
                    break
            n_tiled = tn is not None and tn < D
        if n_tiled:
            w_itemsize = params["w"].dtype.itemsize
            streamed_bytes = 2 * (D * tn * w_itemsize
                                  + (tn * 4 if use_bias else 0))
            fixed_bytes = 0
        else:
            fixed_bytes, streamed_bytes = wbuf * w_bytes, 0

    tb, nb, vmem_limit = _plan_tiles(B, D, act_itemsize, fixed_bytes,
                                     streamed_bytes, x_is_x0, batch_tile,
                                     budget)

    # --- advisory cost estimate ----------------------------------------------
    if low_rank:
        flops = 4 * B * D * params["proj_dim"] + 4 * B * D
    else:
        flops = 2 * B * D * D + 4 * B * D
    n_act = (1 if x_is_x0 else 2) + 1
    cost = pl.CostEstimate(flops=int(flops), transcendentals=0,
                           bytes_accessed=int(n_act * B * D * act_itemsize
                                              + w_bytes))

    # --- specs / args ---------------------------------------------------------
    if n_tiled:
        kernel = functools.partial(_dcn_cross_ntiled_kernel, use_bias=use_bias,
                                   diag_scale=diag_scale, x_is_x0=x_is_x0, tn=tn)
        grid = (nb, D // tn)
        dims = ("parallel", "parallel")
        out_specs = pl.BlockSpec((tb, tn), lambda i, n: (i, n))

        def _in_specs(_sb):
            specs = [pl.BlockSpec((tb, D), lambda i, n: (i, 0))]
            if not x_is_x0:
                specs.append(pl.BlockSpec((tb, D), lambda i, n: (i, 0)))
            specs.append(pl.BlockSpec((D, tn), lambda i, n: (0, n)))
            if use_bias:
                specs.append(pl.BlockSpec((1, tn), lambda i, n: (0, n)))
            return specs

        args = [x0] + ([] if x_is_x0 else [x]) + [params["w"]] \
            + ([params["b"]] if use_bias else [])
    else:
        kernel = functools.partial(_dcn_cross_kernel, low_rank=low_rank,
                                   use_bias=use_bias, diag_scale=diag_scale,
                                   x_is_x0=x_is_x0)
        grid = (nb,)
        dims = ("parallel",)
        out_specs = pl.BlockSpec((tb, D), lambda i: (i, 0))

        def _in_specs(sb):
            specs = [pl.BlockSpec((tb, D), lambda i: (i, 0))]
            if not x_is_x0:
                specs.append(pl.BlockSpec((tb, D), lambda i: (i, 0)))
            if low_rank:
                P = params["proj_dim"]
                specs.append(_resident_spec((D, P), sb))
                if use_bias:
                    specs.append(_resident_spec((1, P), sb))
                specs.append(_resident_spec((P, D), sb))
                if use_bias:
                    specs.append(_resident_spec((1, D), sb))
            else:
                specs.append(_resident_spec((D, D), sb))
                if use_bias:
                    specs.append(_resident_spec((1, D), sb))
            return specs

        if low_rank:
            args = [x0] + ([] if x_is_x0 else [x]) + [params["u"]] \
                + ([params["bu"]] if use_bias else []) + [params["v"]] \
                + ([params["bv"]] if use_bias else [])
        else:
            args = [x0] + ([] if x_is_x0 else [x]) + [params["w"]] \
                + ([params["b"]] if use_bias else [])

    def _run(sb):
        return pl.pallas_call(
            kernel,
            out_shape=jax.ShapeDtypeStruct((B, D), out_dtype),
            grid_spec=pltpu.PrefetchScalarGridSpec(
                num_scalar_prefetch=0, grid=grid,
                in_specs=_in_specs(sb), out_specs=out_specs),
            compiler_params=pltpu.CompilerParams(
                dimension_semantics=dims, vmem_limit_bytes=vmem_limit),
            cost_estimate=cost,
        )(*args)

    if single_buffer and not n_tiled:
        try:
            return _run(True)
        except Exception:
            _BUFFERED1 = False          # remember for subsequent calls
            return _run(False)
    return _run(False)


def dcn_cross_stack(x0, x=None, *, layer_params, batch_tile=None):
    """Fused stack of DCNCross layers (x_{i+1} = x0 * (W_i x_i + b_i) + x_i)
    in ONE pallas_call: activations stream through HBM once, all layer weights
    stay resident in VMEM. Falls back to per-layer calls if they do not fit."""
    global _BUFFERED1

    if not layer_params:
        raise ValueError("layer_params must be non-empty")
    kind = layer_params[0]["kind"]
    D = layer_params[0]["in_dim"]
    use_bias = layer_params[0]["use_bias"]
    diag_scale = float(layer_params[0].get("diag_scale", 0.0))
    for p in layer_params:
        if (p["kind"], p["in_dim"], p["use_bias"],
                float(p.get("diag_scale", 0.0))) != (kind, D, use_bias,
                                                     diag_scale):
            raise ValueError("all layers in a fused stack must share the same "
                             "config (kind / in_dim / use_bias / diag_scale)")
    low_rank = kind == "low"

    x_is_x0 = (x is None) or (x is x0)
    B = x0.shape[0]
    out_dtype = x0.dtype
    act_itemsize = jnp.dtype(out_dtype).itemsize
    budget = _vmem_budget()
    single_buffer = _buffered1_supported()
    wbuf = 1 if single_buffer else 2

    def _weights_bytes(mult):
        total = 0
        for p in layer_params:
            if low_rank:
                total += (p["u"].size * p["u"].dtype.itemsize
                          + p["v"].size * p["v"].dtype.itemsize)
                if use_bias:
                    total += (p["bu"].size + p["bv"].size) * 4
            else:
                total += p["w"].size * p["w"].dtype.itemsize
                if use_bias:
                    total += p["b"].size * 4
        return mult * total

    fixed_bytes = _weights_bytes(wbuf)
    if fixed_bytes > (budget * 3) // 5:
        # Stack weights do not comfortably fit in VMEM: per-layer calls.
        out = dcn_cross(x0, x, params=layer_params[0], batch_tile=batch_tile)
        for p in layer_params[1:]:
            out = dcn_cross(x0, out, params=p, batch_tile=batch_tile)
        return out

    tb, nb, vmem_limit = _plan_tiles(B, D, act_itemsize, fixed_bytes, 0,
                                     x_is_x0, batch_tile, budget)

    kernel = functools.partial(_dcn_stack_kernel, low_rank=low_rank,
                               use_bias=use_bias, diag_scale=diag_scale,
                               num_layers=len(layer_params), x_is_x0=x_is_x0)

    def _in_specs(sb):
        specs = [pl.BlockSpec((tb, D), lambda i: (i, 0))]
        if not x_is_x0:
            specs.append(pl.BlockSpec((tb, D), lambda i: (i, 0)))
        for p in layer_params:
            if low_rank:
                P = p["proj_dim"]
                specs.append(_resident_spec((D, P), sb))
                if use_bias:
                    specs.append(_resident_spec((1, P), sb))
                specs.append(_resident_spec((P, D), sb))
                if use_bias:
                    specs.append(_resident_spec((1, D), sb))
            else:
                specs.append(_resident_spec((D, D), sb))
                if use_bias:
                    specs.append(_resident_spec((1, D), sb))
        return specs

    args = [x0] + ([] if x_is_x0 else [x])
    flops = 0
    for p in layer_params:
        if low_rank:
            args += [p["u"]] + ([p["bu"]] if use_bias else []) \
                + [p["v"]] + ([p["bv"]] if use_bias else [])
            flops += 4 * B * D * p["proj_dim"] + 4 * B * D
        else:
            args += [p["w"]] + ([p["b"]] if use_bias else [])
            flops += 2 * B * D * D + 4 * B * D
    n_act = (1 if x_is_x0 else 2) + 1
    cost = pl.CostEstimate(flops=int(flops), transcendentals=0,
                           bytes_accessed=int(n_act * B * D * act_itemsize
                                              + _weights_bytes(1)))

    def _run(sb):
        return pl.pallas_call(
            kernel,
            out_shape=jax.ShapeDtypeStruct((B, D), out_dtype),
            grid_spec=pltpu.PrefetchScalarGridSpec(
                num_scalar_prefetch=0, grid=(nb,),
                in_specs=_in_specs(sb),
                out_specs=pl.BlockSpec((tb, D), lambda i: (i, 0))),
            compiler_params=pltpu.CompilerParams(
                dimension_semantics=("parallel",),
                vmem_limit_bytes=vmem_limit),
            cost_estimate=cost,
        )(*args)

    if single_buffer:
        try:
            return _run(True)
        except Exception:
            _BUFFERED1 = False
            return _run(False)
    return _run(False)


# ----------------------------------------------------------------------------
# Pure-JAX reference (mirrors the PyTorch module, torch weight layout)
# ----------------------------------------------------------------------------
def _ref_layer(x0, x, *, w=None, b=None, u=None, bu=None, v=None, bv=None,
               diag_scale=0.0):
    if w is not None:
        prod = x @ w.T
        if b is not None:
            prod = prod + b
    else:
        prod = x @ u.T
        if bu is not None:
            prod = prod + bu
        prod = prod @ v.T
        if bv is not None:
            prod = prod + bv
    if diag_scale:
        prod = prod + diag_scale * x
    return x0 * prod + x


# ----------------------------------------------------------------------------
# Demo / self-test
# ----------------------------------------------------------------------------
if __name__ == "__main__":
    key = jax.random.PRNGKey(0)
    B, D, P = 8, 32, 8               # batch, in_dim, projection_dim
    diag_scale = 0.1
    ks = jax.random.split(key, 16)

    x0 = jax.random.normal(ks[0], (B, D), dtype=jnp.float32)
    xi = jax.random.normal(ks[1], (B, D), dtype=jnp.float32)

    lim_d = 1.0 / (D ** 0.5)
    w = jax.random.uniform(ks[2], (D, D), minval=-lim_d, maxval=lim_d)    # (out, in)
    b = jax.random.uniform(ks[3], (D,), minval=-lim_d, maxval=lim_d)
    u = jax.random.uniform(ks[4], (P, D), minval=-lim_d, maxval=lim_d)    # (out, in)
    bu = jax.random.uniform(ks[5], (P,), minval=-lim_d, maxval=lim_d)
    lim_p = 1.0 / (P ** 0.5)
    v = jax.random.uniform(ks[6], (D, P), minval=-lim_p, maxval=lim_p)    # (out, in)
    bv = jax.random.uniform(ks[7], (D,), minval=-lim_p, maxval=lim_p)

    # One-time parameter prep (transpose + diag-fold hoisted out of forward).
    full_p = prepare_dcn_cross_params(w=w, b=b, diag_scale=diag_scale)
    full_p_nobias = prepare_dcn_cross_params(w=w, diag_scale=diag_scale)
    low_p = prepare_dcn_cross_params(u=u, bu=bu, v=v, bv=bv,
                                     diag_scale=diag_scale)
    low_p_nobias = prepare_dcn_cross_params(u=u, v=v, diag_scale=diag_scale)

    # 1) Full-rank, x provided (diag_scale folded into W' at prep time).
    out = jax.block_until_ready(dcn_cross(x0, xi, params=full_p))
    ref = _ref_layer(x0, xi, w=w, b=b, diag_scale=diag_scale)
    assert out.shape == (B, D) and out.dtype == jnp.float32
    assert jnp.allclose(out, ref, atol=1e-5, rtol=1e-5)

    # 2) First layer in a stack (x=None -> x=x0): input DMA'd only once.
    out = jax.block_until_ready(dcn_cross(x0, params=full_p))
    ref = _ref_layer(x0, x0, w=w, b=b, diag_scale=diag_scale)
    assert jnp.allclose(out, ref, atol=1e-5, rtol=1e-5)

    # 3) Full-rank, use_bias=False.
    out = jax.block_until_ready(dcn_cross(x0, xi, params=full_p_nobias))
    ref = _ref_layer(x0, xi, w=w, diag_scale=diag_scale)
    assert jnp.allclose(out, ref, atol=1e-5, rtol=1e-5)

    # 4) Low-rank with bias (diag_scale handled in-kernel).
    out = jax.block_until_ready(dcn_cross(x0, xi, params=low_p))
    ref = _ref_layer(x0, xi, u=u, bu=bu, v=v, bv=bv, diag_scale=diag_scale)
    assert jnp.allclose(out, ref, atol=1e-5, rtol=1e-5)

    # 5) Low-rank, use_bias=False.
    out = jax.block_until_ready(dcn_cross(x0, xi, params=low_p_nobias))
    ref = _ref_layer(x0, xi, u=u, v=v, diag_scale=diag_scale)
    assert jnp.allclose(out, ref, atol=1e-5, rtol=1e-5)

    # 6) Multi-step pipelined grid + masked partial last batch tile (cdiv grid).
    B2 = 20
    x0b = jax.random.normal(ks[8], (B2, D), dtype=jnp.float32)
    xib = jax.random.normal(ks[9], (B2, D), dtype=jnp.float32)
    out = jax.block_until_ready(
        dcn_cross(x0b, xib, params=full_p, batch_tile=16))
    ref = _ref_layer(x0b, xib, w=w, b=b, diag_scale=diag_scale)
    assert jnp.allclose(out, ref, atol=1e-5, rtol=1e-5)

    # 7) Output-feature-tiled weight path (removes the large-weight cliff).
    D3 = 256
    lim3 = 1.0 / (D3 ** 0.5)
    w3 = jax.random.uniform(ks[10], (D3, D3), minval=-lim3, maxval=lim3)
    b3 = jax.random.uniform(ks[11], (D3,), minval=-lim3, maxval=lim3)
    x03 = jax.random.normal(ks[12], (16, D3), dtype=jnp.float32)
    xi3 = jax.random.normal(ks[13], (16, D3), dtype=jnp.float32)
    full_p3 = prepare_dcn_cross_params(w=w3, b=b3, diag_scale=diag_scale)
    out = jax.block_until_ready(
        dcn_cross(x03, xi3, params=full_p3, batch_tile=8, feature_tile=128))
    ref = _ref_layer(x03, xi3, w=w3, b=b3, diag_scale=diag_scale)
    assert jnp.allclose(out, ref, atol=1e-4, rtol=1e-4)

    # 8) bf16 activations + bf16 weights fed directly to the MXU (f32 accum).
    full_p_bf16 = prepare_dcn_cross_params(w=w, b=b, diag_scale=diag_scale,
                                           param_dtype=jnp.bfloat16)
    out = jax.block_until_ready(
        dcn_cross(x0.astype(jnp.bfloat16), xi.astype(jnp.bfloat16),
                  params=full_p_bf16))
    ref = _ref_layer(x0, xi, w=w, b=b, diag_scale=diag_scale)
    assert out.dtype == jnp.bfloat16
    assert jnp.allclose(out.astype(jnp.float32), ref, atol=1e-1, rtol=1e-1)

    # 9) Fused 3-layer stack in a single pallas_call (weights resident,
    #    activations stream through HBM once).
    stack_ws, stack_bs, stack_params = [], [], []
    for li in range(3):
        kw, kb = jax.random.split(jax.random.fold_in(ks[14], li))
        wl = jax.random.uniform(kw, (D, D), minval=-lim_d, maxval=lim_d)
        bl = jax.random.uniform(kb, (D,), minval=-lim_d, maxval=lim_d)
        stack_ws.append(wl)
        stack_bs.append(bl)
        stack_params.append(
            prepare_dcn_cross_params(w=wl, b=bl, diag_scale=diag_scale))
    out = jax.block_until_ready(
        dcn_cross_stack(x0, layer_params=stack_params))
    ref = x0
    for wl, bl in zip(stack_ws, stack_bs):
        ref = _ref_layer(x0, ref, w=wl, b=bl, diag_scale=diag_scale)
    assert jnp.allclose(out, ref, atol=1e-4, rtol=1e-4)

    print("KERNEL_OK")
</pallas_src>

<mosaic_0001>
module attributes {stable_mosaic.version = 11 : i64} {
  func.func @_probe(%arg0: i32, %arg1: memref<8x128xf32, #tpu.memory_space<vmem>>, %arg2: memref<8x128xf32, #tpu.memory_space<vmem>>, %arg3: memref<8x128xf32, #tpu.memory_space<vmem>>) attributes {dimension_semantics = [#tpu.dimension_semantics<arbitrary>], iteration_bounds = array<i64: 2>, scalar_prefetch = 0 : i64, scratch_operands = 0 : i64, tpu.core_type = #tpu.core_type<tc>, window_params = [{pipeline_mode = #tpu.pipeline_mode<synchronous>, transform_indices = @transform_0, window_bounds = array<i64: 8, 128>}, {transform_indices = @transform_1, window_bounds = array<i64: 8, 128>}, {transform_indices = @transform_2, window_bounds = array<i64: 8, 128>}]} {
    %c0 = arith.constant 0 : index
    %c0_0 = arith.constant 0 : index
    %0 = vector.load %arg2[%c0, %c0_0] : memref<8x128xf32, #tpu.memory_space<vmem>>, vector<8x128xf32>
    %c0_1 = arith.constant 0 : index
    %c0_2 = arith.constant 0 : index
    %1 = vector.load %arg1[%c0_1, %c0_2] : memref<8x128xf32, #tpu.memory_space<vmem>>, vector<8x128xf32>
    %2 = arith.addf %0, %1 : vector<8x128xf32>
    %c0_3 = arith.constant 0 : index
    %c0_4 = arith.constant 0 : index
    %3 = vector.load %arg3[%c0_3, %c0_4] : memref<8x128xf32, #tpu.memory_space<vmem>>, vector<8x128xf32>
    tpu.vector_store %arg3[%c0_3, %c0_4], %2 {strides = array<i32>} : memref<8x128xf32, #tpu.memory_space<vmem>>, vector<8x128xf32>,
    return
  }
  func.func @transform_0(%arg0: i32) -> (i32, i32) {
    %c0_i32 = arith.constant 0 : i32
    %c0_i32_0 = arith.constant 0 : i32
    %c0_i32_1 = arith.constant 0 : i32
    return %c0_i32, %c0_i32_0 : i32, i32
  }
  func.func @transform_1(%arg0: i32) -> (i32, i32) {
    %c0_i32 = arith.constant 0 : i32
    %c0_i32_0 = arith.constant 0 : i32
    return %arg0, %c0_i32 : i32, i32
  }
  func.func @transform_2(%arg0: i32) -> (i32, i32) {
    %c0_i32 = arith.constant 0 : i32
    %c0_i32_0 = arith.constant 0 : i32
    return %arg0, %c0_i32 : i32, i32
  }
}

module attributes {stable_mosaic.version = 11 : i64} {
  func.func @_dcn_cross_kernel(%arg0: i32, %arg1: memref<8x32xf32, #tpu.memory_space<vmem>>, %arg2: memref<8x32xf32, #tpu.memory_space<vmem>>, %arg3: memref<32x32xf32, #tpu.memory_space<vmem>>, %arg4: memref<1x32xf32, #tpu.memory_space<vmem>>, %arg5: memref<8x32xf32, #tpu.memory_space<vmem>>) attributes {dimension_semantics = [#tpu.dimension_semantics<parallel>], iteration_bounds = array<i64: 1>, scalar_prefetch = 0 : i64, scratch_operands = 0 : i64, tpu.core_type = #tpu.core_type<tc>, window_params = [{transform_indices = @transform_0, window_bounds = array<i64: 8, 32>}, {transform_indices = @transform_1, window_bounds = array<i64: 8, 32>}, {pipeline_mode = #tpu.pipeline_mode<synchronous>, transform_indices = @transform_2, window_bounds = array<i64: 32, 32>}, {pipeline_mode = #tpu.pipeline_mode<synchronous>, transform_indices = @transform_3, window_bounds = array<i64: 1, 32>}, {transform_indices = @transform_4, window_bounds = array<i64: 8, 32>}]} {
    %c0 = arith.constant 0 : index
    %c0_0 = arith.constant 0 : index
    %0 = vector.load %arg2[%c0, %c0_0] : memref<8x32xf32, #tpu.memory_space<vmem>>, vector<8x32xf32>
    %c0_1 = arith.constant 0 : index
    %c0_2 = arith.constant 0 : index
    %1 = vector.load %arg3[%c0_1, %c0_2] : memref<32x32xf32, #tpu.memory_space<vmem>>, vector<32x32xf32>
    %cst = arith.constant dense<0.000000e+00> : vector<8x32xf32>
    %2 = tpu.matmul %0, %1, %cst {dimension_numbers = #tpu.dot_dimension_numbers<[1], [0], [0], [1], [0, 0, 1, 1], [], []>} : vector<8x32xf32>, vector<32x32xf32>, vector<8x32xf32> -> vector<8x32xf32>
    %c0_3 = arith.constant 0 : index
    %c0_4 = arith.constant 0 : index
    %3 = vector.load %arg4[%c0_3, %c0_4] : memref<1x32xf32, #tpu.memory_space<vmem>>, vector<1x32xf32>
    %4 = vector.broadcast %3 : vector<1x32xf32> to vector<8x32xf32>
    %5 = arith.addf %2, %4 : vector<8x32xf32>
    %c0_5 = arith.constant 0 : index
    %c0_6 = arith.constant 0 : index
    %6 = vector.load %arg1[%c0_5, %c0_6] : memref<8x32xf32, #tpu.memory_space<vmem>>, vector<8x32xf32>
    %7 = arith.mulf %6, %5 : vector<8x32xf32>
    %8 = arith.addf %7, %0 : vector<8x32xf32>
    %c0_7 = arith.constant 0 : index
    %c0_8 = arith.constant 0 : index
    %9 = vector.load %arg5[%c0_7, %c0_8] : memref<8x32xf32, #tpu.memory_space<vmem>>, vector<8x32xf32>
    tpu.vector_store %arg5[%c0_7, %c0_8], %8 {strides = array<i32>} : memref<8x32xf32, #tpu.memory_space<vmem>>, vector<8x32xf32>,
    return
  }
  func.func @transform_0(%arg0: i32) -> (i32, i32) {
    %c0_i32 = arith.constant 0 : i32
    %c0_i32_0 = arith.constant 0 : i32
    return %arg0, %c0_i32 : i32, i32
  }
  func.func @transform_1(%arg0: i32) -> (i32, i32) {
    %c0_i32 = arith.constant 0 : i32
    %c0_i32_0 = arith.constant 0 : i32
    return %arg0, %c0_i32 : i32, i32
  }
  func.func @transform_2(%arg0: i32) -> (i32, i32) {
    %c0_i32 = arith.constant 0 : i32
    %c0_i32_0 = arith.constant 0 : i32
    %c0_i32_1 = arith.constant 0 : i32
    return %c0_i32, %c0_i32_0 : i32, i32
  }
  func.func @transform_3(%arg0: i32) -> (i32, i32) {
    %c0_i32 = arith.constant 0 : i32
    %c0_i32_0 = arith.constant 0 : i32
    %c0_i32_1 = arith.constant 0 : i32
    return %c0_i32, %c0_i32_0 : i32, i32
  }
  func.func @transform_4(%arg0: i32) -> (i32, i32) {
    %c0_i32 = arith.constant 0 : i32
    %c0_i32_0 = arith.constant 0 : i32
    return %arg0, %c0_i32 : i32, i32
  }
}

</mosaic_0001>

<bundles_post_ra>
// kernel: tpu_custom_call.1
= control target key start
LH: loop header
LB: loop body
LE: loop exit
PB: predicated region body
PF: predicated region fallthrough
CT: control target
= control target key end

     0   :  { %7 = vsyncpa [#allocation3], 0  ;;  %s692_s0 = inlined_call_operand.hbm [shape: f32[8,128], index: 0, kind: input, shape index: {}]   ;;  %s693_s1 = inlined_call_operand.hbm [shape: f32[16,128], index: 1, kind: input, shape index: {}]   ;;  %s694_s2 = inlined_call_operand.hbm [shape: f32[16,128], index: 2, kind: output, shape index: {}]  }
   0x1   :  { %8 = vsyncpa [#allocation6], 0 }
   0x2   :  { %10 = vsyncpa [#allocation6 + $0x1], 0 }
   0x3   :  { %11 = vsyncpa [#allocation4], 0 }
   0x4   :  { %13 = vsyncpa [#allocation4 + $0x1], 0  ;;  %s491_s9 = smov 0   ;;  %s493_s10 = smov 0  }
   0x5   :  { %s495_s11 = smov 0   ;;  %s497_s12 = smov 0  }
   0x6 LB: > { %s512_s13 = sadd.s32 4294967295, %s471_s12   ;;  %s272_s14 = sadd.s32 4294967294, %s471_s12   ;;  %s471_s12 = sphi %s497_s12, %s718_s12   ;;  %s467_s11 = sphi %s495_s11, %s717_s11   ;;  %s463_s10 = sphi %s493_s10, %s716_s10   ;;  %s459_s9 = sphi %s491_s9, %s715_s9  }
   0x7   : > { %p60_p0 = scmp.ne.s32.totalorder %s463_s10, %s459_s9  ;;  %p695_p1 = scmp.eq.s32.totalorder %s512_s13, 0 }
   0x8   : > { %p90_p3 = scmp.eq.s32.totalorder %s272_s14, 1  ;;  %p273_p5 = scmp.ge.s32.totalorder %s471_s12, 1 }
   0x9   : > { %p521_p4 = por %p695_p1, %p60_p0  ;;  %p97_p7 = scmp.lt.s32.totalorder %s471_s12, 3 }
   0xa   : > { %p526_p6 = por %p90_p3, %p60_p0  ;;  %s473_s18 = smov [#allocation2]  }
   0xb   : > { %s698_s15 = scalar_select %p521_p4, 1, 0 }
   0xc   : > { %s699_s16 = scalar_select %p526_p6, 1, 0 }
   0xd   : > { %p531_p8 = pnand %p273_p5, %p97_p7  ;;  %s110_s19 = sshll.u32 %s473_s18, 4  ;;  %s111_s19 = int_to_ptr.vmem [resolvable:$true] %s110_s19 }
   0xe   : > { %s539_s20 = sadd.s32 1, %s471_s12   ;;  %s47_s24 = sadd.s32 1, %s467_s11 }
   0xf   : > { %s700_s17 = scalar_select %p531_p8, 1, 0 }
  0x10   : > { %p294_p10 = pneg %p531_p8  ;;  %s44_s22 = ssub.s32 %s471_s12, %s539_s20 }
  0x11   : > { %p549_p12 = scmp.eq.s32.totalorder %s44_s22, 0  ;;  %s343_s27 = scalar_lea.hbm %s692_s0, 128 }
  0x12   : > { %p543_p11 = pnand %p294_p10, %p695_p1  ;;  %p344_p0 = scmp.ne.s32.totalorder %s692_s0, %s343_s27 }
  0x13   : > { %s702_s23 = scalar_select %p549_p12, 1, 0 }
  0x14   : > { %p345_p3 = pneg %p543_p11  ;;  %p350_p10 = scmp.lt.u32.totalorder %s343_s27, %s692_s0 }
  0x16   : > { %p346_p5 = pnand %p345_p3, %p344_p0 }
  0x18   : > { %p347_p7 = pneg %p346_p5 }
  0x1a   : > { %p352_p9 = pnand %p350_p10, %p347_p7 }
  0x1c   : > { %355 = shalt.err (!%p352_p9)
}
  0x1d   : > { %s356_s4 = scalar_lea.vmem %s111_s19, 128  ;;  %p364_p6 = scmp.lt.s32.totalorder %s111_s19, %s111_s19 }
  0x1e   : > { %p357_p1 = scmp.ne.s32.totalorder %s111_s19, %s356_s4  ;;  %p365_p4 = scmp.lt.s32.totalorder %s356_s4, %s356_s4 }
  0x20   : > { %p359_p2 = pnand %p357_p1, %p345_p3  ;;  %p366_p8 = por %p365_p4, %p364_p6 }
  0x22   : > { %p360_p13 = pneg %p359_p2 }
  0x24   : > { %p367_p12 = pnand %p366_p8, %p360_p13 }
  0x26   : > { %370 = shalt.err (!%p367_p12)
}
  0x27   : > { %297 = dma.hbm_to_vmem [thread:$0]  (!%p543_p11), %s692_s0, 128, %s111_s19, [#allocation3]  }
  0x28   : > { %p703_p1 = scmp.ne.s32.totalorder %s702_s23, 0  ;;  %p55_p2 = scmp.eq.s32.totalorder %s471_s12, 0 }
  0x29   : > { %p704_p4 = scmp.ne.s32.totalorder %s467_s11, %s463_s10  ;;  %p705_p6 = scmp.eq.s32.totalorder %s512_s13, 1 }
  0x2a   : > { %s575_s7 = scalar_select %p703_p1, %s467_s11, %s47_s24  }
  0x2b   : > { %p583_p8 = por %p705_p6, %p704_p4  ;;  %p307_p9 = scmp.lt.s32.totalorder %s471_s12, 2 }
  0x2c   : > { %s121_s14 = sand.u32 1, %s467_s11   ;;  %p707_p12 = pmov %p704_p4 }
  0x2d   : > { %s276_s18 = sshll.u32 %s121_s14, 3  ;;  %s277_s21 = sshll.u32 %s471_s12, 7 }
  0x2e   : > { %p56_p13 = por %p55_p2, %p707_p12  ;;  %s596_s19 = scalar_lea.hbm %s693_s1, %s277_s21 }
  0x2f   : > { %s125_s23 = scalar_lea.vmem [#allocation5], %s276_s18  ;;  %s122_s27 = scalar_lea.sflag [#allocation6], %s121_s14 }
  0x30   : > { %s132_s24 = sshll.u32 %s125_s23, 4  ;;  %p598_p11 = pnand %p307_p9, %p56_p13  ;;  %s602_s24 = int_to_ptr.vmem [resolvable:$true] %s132_s24 }
  0x31   : > { %s371_s28 = scalar_lea.hbm %s596_s19, 128  ;;  %s376_s3 = scalar_lea.hbm %s693_s1, 256 }
  0x32   : > { %p372_p0 = scmp.ne.s32.totalorder %s596_s19, %s371_s28  ;;  %p373_p3 = pneg %p598_p11 }
  0x33   : > { %p377_p10 = scmp.lt.u32.totalorder %s596_s19, %s693_s1  ;;  %p378_p1 = scmp.lt.u32.totalorder %s376_s3, %s371_s28 }
  0x34   : > { %p374_p5 = pnand %p373_p3, %p372_p0  ;;  %p380_p4 = scmp.lt.u32.totalorder %s371_s28, %s596_s19 }
  0x35   : > { %p379_p2 = por %p378_p1, %p377_p10 }
  0x36   : > { %p375_p7 = pneg %p374_p5 }
  0x37   : > { %p381_p6 = por %p380_p4, %p379_p2 }
  0x39   : > { %p382_p9 = pnand %p381_p6, %p375_p7 }
  0x3b   : > { %385 = shalt.err (!%p382_p9)
}
  0x3c   : > { %s386_s6 = scalar_lea.vmem %s602_s24, 128  ;;  %s474_s14 = smov [#allocation5]  }
  0x3d   : > { %p387_p12 = scmp.ne.s32.totalorder %s602_s24, %s386_s6  ;;  %s391_s18 = sshll.u32 %s474_s14, 4  ;;  %s392_s18 = int_to_ptr.vmem [resolvable:$false] %s391_s18 }
  0x3e   : > { %s393_s21 = scalar_lea.vmem %s392_s18, 256  ;;  %p394_p5 = scmp.lt.s32.totalorder %s602_s24, %s392_s18 }
  0x3f   : > { %p389_p13 = pnand %p387_p12, %p373_p3  ;;  %p395_p10 = scmp.lt.s32.totalorder %s393_s21, %s386_s6 }
  0x41   : > { %p390_p0 = pneg %p389_p13  ;;  %p396_p1 = por %p395_p10, %p394_p5 }
  0x43   : > { %p397_p2 = pnand %p396_p1, %p390_p0 }
  0x45   : > { %400 = shalt.err (!%p397_p2)
}
  0x46   : > { %301 = dma.hbm_to_vmem [thread:$0]  (!%p598_p11), %s596_s19, 128, %s602_s24, %s122_s27  }
  0x47   : > { %p709_p7 = scmp.ne.s32.totalorder %s700_s17, 0 }
  0x48   : > { %p710_p3 = scmp.eq.s32.totalorder (!%p709_p7), %s512_s13, 0 }
  0x49   : > { %141 = sbr.rel (%p709_p7) target bundleno = 110 (0x6e), region = 28 }
  0x50   : > { %446 = dma.done.wait (%p710_p3), [#allocation3], 128   ;;  %p711_p4 = pmov %p710_p3 }
  0x51   : > { %s636_s22 = sand.u32 1, %s463_s10   ;;  %p712_p6 = scmp.ne.s32.totalorder %s698_s15, 0 }
  0x52   : > { %448 = vsyncadd (%p711_p4), [#allocation3], 4294967168  ;;  %s280_s25 = sshll.u32 %s636_s22, 3  ;;  %s148_s23 = scalar_lea.sflag [#allocation6], %s636_s22 }
  0x53   : > { %s151_s26 = scalar_lea.vmem [#allocation5], %s280_s25 }
  0x54   : > { %450 = dma.done.wait (%p712_p6), %s148_s23, 128  }
  0x55   : > { %452 = vsyncadd (%p712_p6), %s148_s23, 4294967168  ;;  %s171_s17 = scalar_lea.vmem [#allocation7], %s280_s25  ;;  %s283_s24 = sshll.u32 %s512_s13, 7  ;;  %v172_v0 = vld [vmem:[%s151_s26] sm:$0xff]  ;;  %v173_v1 = vld [vmem:[#allocation2] sm:$0xff] }
  0x56   : > { %s190_s19 = sshll.u32 %s171_s17, 4  ;;  %v174_v2 = vadd.f32 %v173_v1, %v172_v0  ;;  %s650_s29 = scalar_lea.hbm %s694_s2, %s283_s24  ;;  %s645_s19 = int_to_ptr.vmem [resolvable:$true] %s190_s19 }
  0x57   : > { %s177_s15 = scalar_lea.sflag [#allocation4], %s636_s22  ;;  %s401_s30 = scalar_lea.vmem %s645_s19, 128 }
  0x58   : > { %175 = vst [vmem:[%s171_s17] sm:$0xff] %v174_v2  ;;  %p402_p11 = scmp.ne.s32.totalorder %s645_s19, %s401_s30  ;;  %s475_s13 = smov [#allocation7]  }
  0x59   : > { %s405_s3 = sshll.u32 %s475_s13, 4  ;;  %s406_s3 = int_to_ptr.vmem [resolvable:$false] %s405_s3 }
  0x5a   : > { %p403_p9 = pnand %p402_p11, %p583_p8  ;;  %s407_s4 = scalar_lea.vmem %s406_s3, 256 }
  0x5b   : > { %p408_p13 = scmp.lt.s32.totalorder %s645_s19, %s406_s3  ;;  %p409_p0 = scmp.lt.s32.totalorder %s407_s4, %s401_s30 }
  0x5c   : > { %p404_p12 = pneg %p403_p9 }
  0x5d   : > { %p410_p5 = por %p409_p0, %p408_p13 }
  0x5f   : > { %p411_p10 = pnand %p410_p5, %p404_p12 }
  0x61   : > { %414 = shalt.err (!%p411_p10)
}
  0x62   : > { %s415_s5 = scalar_lea.hbm %s650_s29, 128  ;;  %s419_s18 = scalar_lea.hbm %s694_s2, 256 }
  0x63   : > { %p416_p1 = scmp.ne.s32.totalorder %s650_s29, %s415_s5  ;;  %p420_p3 = scmp.lt.u32.totalorder %s650_s29, %s694_s2 }
  0x64   : > { %p421_p4 = scmp.lt.u32.totalorder %s419_s18, %s415_s5  ;;  %p423_p11 = scmp.lt.u32.totalorder %s415_s5, %s650_s29 }
  0x65   : > { %p417_p2 = pnand %p416_p1, %p583_p8 }
  0x66   : > { %p422_p6 = por %p421_p4, %p420_p3 }
  0x67   : > { %p418_p7 = pneg %p417_p2 }
  0x68   : > { %p424_p9 = por %p423_p11, %p422_p6 }
  0x6a   : > { %p425_p12 = pnand %p424_p9, %p418_p7 }
  0x6c   : > { %428 = shalt.err (!%p425_p12)
}
  0x6d   : > { %292 = dma.vmem_to_hbm [thread:$0]  (%p583_p8), %s645_s19, 128, %s650_s29, %s177_s15  }
  0x6e PF: > { %s202_s25 = sand.u32 1, %s459_s9   ;;  %p713_p13 = scmp.ne.s32.totalorder %s699_s16, 0 }
  0x6f   : > { %p714_p0 = scmp.ge.s32.totalorder %s471_s12, 2  ;;  %s203_s23 = scalar_lea.sflag [#allocation4], %s202_s25 }
  0x71   : > { %p303_p5 = pnand %p714_p0, %p713_p13 }
  0x73   : > { %454 = dma.done.wait (!%p303_p5), %s203_s23, 128  }
  0x74   : > { %456 = vsyncadd (!%p303_p5), %s203_s23, 4294967168  ;;  %p16_p10 = scmp.ge.s32.totalorder %s539_s20, 4   ;;  %s715_s9 = smov %s463_s10 }
  0x75   : > { %s716_s10 = smov %s467_s11  ;;  %s717_s11 = smov %s575_s7 }
  0x76   : > { %s718_s12 = smov %s539_s20  ;;  %18 = sbr.rel (!%p16_p10) target bundleno = 6 (0x6), region = 78 }
  0x7d   :  { %208 = vsyncpa [#allocation3], 1 }
  0x7e   :  { %210 = vsyncpa [#allocation3 + $0x1], 1 }
  0x7f   :  { %211 = vsyncpa [#allocation6], 1 }
  0x80   :  { %213 = vsyncpa [#allocation6 + $0x1], 1 }
  0x81   :  { %214 = vsyncpa [#allocation4], 1 }
  0x82   :  { %216 = vsyncpa [#allocation4 + $0x1], 1 }

// kernel: tpu_custom_call.1
= control target key start
LH: loop header
LB: loop body
LE: loop exit
PB: predicated region body
PF: predicated region fallthrough
CT: control target
= control target key end

     0   :  { %9 = vsyncpa [#allocation3], 0  ;;  %s373_s0 = inlined_call_operand.hbm [shape: f32[8,32], index: 0, kind: input, shape index: {}]   ;;  %s374_s1 = inlined_call_operand.hbm [shape: f32[8,32], index: 1, kind: input, shape index: {}]   ;;  %s375_s2 = inlined_call_operand.hbm [shape: f32[32,32], index: 2, kind: input, shape index: {}]   ;;  %s376_s3 = inlined_call_operand.vmem [shape: f32[1,32], index: 3, kind: input, shape index: {}]   ;;  %s377_s4 = inlined_call_operand.hbm [shape: f32[8,32], index: 4, kind: output, shape index: {}]  }
   0x1   :  { %10 = vsyncpa [#allocation6], 0 }
   0x2   :  { %11 = vsyncpa [#allocation4], 0  ;;  %s288_s15 = smov [#allocation5]   ;;  %s289_s17 = smov [#allocation2]  }
   0x3   :  { %s28_s16 = sshll.u32 %s288_s15, 4  ;;  %s18_s18 = sshll.u32 %s289_s17, 4  ;;  %s29_s16 = int_to_ptr.vmem [resolvable:$true] %s28_s16  ;;  %s19_s18 = int_to_ptr.vmem [resolvable:$true] %s18_s18 }
   0x4   :  { %s194_s21 = scalar_lea.hbm %s374_s1, 128 }
   0x5   :  { %p195_p0 = scmp.ne.s32.totalorder %s374_s1, %s194_s21  ;;  %p198_p1 = scmp.lt.u32.totalorder %s194_s21, %s374_s1 }
   0x7   :  { %p200_p2 = pnand %p198_p1, %p195_p0 }
   0x9   :  { %203 = shalt.err (!%p200_p2)
}
   0xa   :  { %s204_s26 = scalar_lea.vmem %s29_s16, 128  ;;  %p209_p4 = scmp.lt.s32.totalorder %s29_s16, %s29_s16 }
   0xb   :  { %p205_p3 = scmp.ne.s32.totalorder %s29_s16, %s204_s26  ;;  %p210_p5 = scmp.lt.s32.totalorder %s204_s26, %s204_s26 }
   0xd   :  { %p211_p6 = por %p210_p5, %p209_p4 }
   0xf   :  { %p212_p7 = pnand %p211_p6, %p205_p3 }
  0x11   :  { %215 = shalt.err (!%p212_p7)
}
  0x12   :  { %31 = dma.hbm_to_vmem [thread:$0]  %s374_s1, 128, %s29_s16, [#allocation6]  }
  0x13   :  { %s216_s5 = scalar_lea.hbm %s373_s0, 128 }
  0x14   :  { %p217_p8 = scmp.ne.s32.totalorder %s373_s0, %s216_s5  ;;  %p220_p9 = scmp.lt.u32.totalorder %s216_s5, %s373_s0 }
  0x16   :  { %p222_p10 = pnand %p220_p9, %p217_p8 }
  0x18   :  { %225 = shalt.err (!%p222_p10)
}
  0x19   :  { %s226_s10 = scalar_lea.vmem %s19_s18, 128  ;;  %p231_p12 = scmp.lt.s32.totalorder %s19_s18, %s19_s18 }
  0x1a   :  { %p227_p11 = scmp.ne.s32.totalorder %s19_s18, %s226_s10  ;;  %p232_p13 = scmp.lt.s32.totalorder %s226_s10, %s226_s10 }
  0x1c   :  { %p233_p0 = por %p232_p13, %p231_p12 }
  0x1e   :  { %p234_p1 = pnand %p233_p0, %p227_p11 }
  0x20   :  { %237 = shalt.err (!%p234_p1)
}
  0x21   :  { %21 = dma.hbm_to_vmem [thread:$0]  %s373_s0, 128, %s19_s18, [#allocation3]  }
  0x22   :  { %s290_s12 = smov [#allocation7]   ;;  %s238_s16 = scalar_lea.hbm %s375_s2, 512 }
  0x23   :  { %s37_s13 = sshll.u32 %s290_s12, 4  ;;  %p239_p2 = scmp.ne.s32.totalorder %s375_s2, %s238_s16  ;;  %s38_s13 = int_to_ptr.vmem [resolvable:$true] %s37_s13 }
  0x24   :  { %p242_p3 = scmp.lt.u32.totalorder %s238_s16, %s375_s2 }
  0x26   :  { %p244_p4 = pnand %p242_p3, %p239_p2 }
  0x28   :  { %247 = shalt.err (!%p244_p4)
}
  0x29   :  { %s248_s22 = scalar_lea.vmem %s38_s13, 512  ;;  %p253_p6 = scmp.lt.s32.totalorder %s38_s13, %s38_s13 }
  0x2a   :  { %p249_p5 = scmp.ne.s32.totalorder %s38_s13, %s248_s22  ;;  %p254_p7 = scmp.lt.s32.totalorder %s248_s22, %s248_s22 }
  0x2c   :  { %p255_p8 = por %p254_p7, %p253_p6 }
  0x2e   :  { %p256_p9 = pnand %p255_p8, %p249_p5 }
  0x30   :  { %259 = shalt.err (!%p256_p9)
}
  0x31   :  { %s291_s0 = smov 128   ;;  %s292_s18 = smov 8  }
  0x32   :  { %43 = dma.hbm_to_vmem [thread:$0]  %s375_s2, 512, %s38_s13, [#allocation6], %s291_s0, %s291_s0, %s292_s18  }
  0x33   :  { %282 = dma.done.wait [#allocation3], 128  }
  0x34   :  { %283 = vsyncadd [#allocation3], 4294967168 }
  0x35   :  { %284 = dma.done.wait [#allocation6], 640  }
  0x36   :  { %285 = vsyncadd [#allocation6], 4294966656  ;;  %v293_v0 = vmov 0.0|0.0   ;;  %vm294_vm0 = vmmov 0   ;;  %v295_v1 = vmov 0.0   ;;  %v56_v2 = vld [vmem:[#allocation7] sm:$0xff] }
  0x37   :  { %179 = vmatprep.subr.bf16.mxu0 %v293_v0  ;;  %176 = vmatprep.mubr.msk.f32.mxu0 %vm294_vm0, %v295_v1  ;;  %v57_v3 = vld [vmem:[#allocation7 + $0x8] sm:$0xff]  ;;  %v58_v4 = vld [vmem:[#allocation7 + $0x10] sm:$0xff]  ;;  %v59_v6 = vld [vmem:[#allocation7 + $0x18] sm:$0xff]  ;;  %vm67_vm1 = vcmask 261120   ;;  %s296_s26 = smov [#allocation8]  }
  0x38   :  { %v180_v5 = vpack.c.bf16 %v57_v3, %v56_v2  ;;  %v183_v7 = vpack.c.bf16 %v59_v6, %v58_v4  ;;  %v55_v8 = vld [vmem:[#allocation5] sm:$0xff]  ;;  %v161_v9 = vld [vmem:[%s376_s3] ss:$0 sm:$0xff]  ;;  %s151_s27 = sshll.u32 %s296_s26, 4  ;;  %s152_s27 = int_to_ptr.vmem [resolvable:$true] %s151_s27 }
  0x39   :  { %v141_v11 = vld [vmem:[#allocation2] sm:$0xff]  ;;  %s260_s28 = scalar_lea.vmem %s152_s27, 128  ;;  %p265_p11 = scmp.lt.s32.totalorder %s152_s27, %s152_s27 }
  0x3a   :  { %181 = vmatpush3.bf16.msra.mxu0 %v180_v5  ;;  %p261_p10 = scmp.ne.s32.totalorder %s152_s27, %s260_s28  ;;  %p266_p12 = scmp.lt.s32.totalorder %s260_s28, %s260_s28 }
  0x3b   :  { %182 = vmatprep.subr.bf16.mxu0 %v293_v0 }
  0x3c   :  { %p267_p13 = por %p266_p12, %p265_p11 }
  0x3e   :  { %184 = vmatpush3.bf16.msra.mxu0 %v183_v7  ;;  %p268_p0 = pnand %p267_p13, %p261_p10 }
  0x41   :  { %177 = vmatmul.mubr.msk.f32.vlgmr.msra.gmra.mrb[0].mxu0 %vm67_vm1, %v55_v8 }
 0x114   :  { %v137_v10 = vpop.f32.mrb[0].mxu0 }
 0x115   :  { %v138_v12 = vadd.f32 %v161_v9, %v137_v10  ;;  %v178_v13 = vpop.f32.mrb[1].mxu0 }
 0x117   :  { %v142_v14 = vmul.f32 %v141_v11, %v138_v12 }
 0x119   :  { %v143_v15 = vadd.f32 %v142_v14, %v55_v8 }
 0x11b   :  { %144 = vst.msk [vmem:[#allocation8] sm:$0xff] %vm67_vm1, %v143_v15 }
 0x11c   :  { %271 = shalt.err (!%p268_p0)
}
 0x11d   :  { %s272_s3 = scalar_lea.hbm %s377_s4, 128 }
 0x11e   :  { %p273_p1 = scmp.ne.s32.totalorder %s377_s4, %s272_s3  ;;  %p276_p2 = scmp.lt.u32.totalorder %s272_s3, %s377_s4 }
 0x120   :  { %p278_p3 = pnand %p276_p2, %p273_p1 }
 0x122   :  { %281 = shalt.err (!%p278_p3)
}
 0x123   :  { %154 = dma.vmem_to_hbm [thread:$0]  %s152_s27, 128, %s377_s4, [#allocation4]  }
 0x124   :  { %286 = dma.done.wait [#allocation4], 128  }
 0x125   :  { %287 = vsyncadd [#allocation4], 4294967168 }
 0x126   :  { %158 = vsyncpa [#allocation3], 1 }
 0x127   :  { %159 = vsyncpa [#allocation6], 1 }
 0x128   :  { %160 = vsyncpa [#allocation4], 1 }

</bundles_post_ra>
